<compile_context>
chip_gen: v7x
topology: tpu7x:2x2x1
jax: 0.10.0
libtpu: 0.0.40
codegen_flags: <defaults>
</compile_context>

<pallas_src>
import jax
import jax.numpy as jnp
from jax import lax
from jax.experimental import pallas as pl
from jax.experimental.pallas import tpu as pltpu

_LANES = 128  # samples packed per row of the [rows, 256] slab


def _round_up(n, m):
    return ((n + m - 1) // m) * m


def _binary_classifier_kernel(b_ref, p_ref, x_ref, o_ref):
    """b_ref: [1] SMEM bias; p_ref: [256, 128] folded-weight matrix (VMEM, resident);
    x_ref: [R, 256] packed input block; o_ref: [R, 128] probabilities."""
    z = jnp.dot(
        x_ref[...], p_ref[...],
        preferred_element_type=jnp.float32,
        precision=lax.Precision.HIGHEST,
    ) + b_ref[0]
    # sigmoid(z) == 0.5 * tanh(z / 2) + 0.5  (exact; one EUP transcendental per vreg)
    o_ref[...] = (0.5 * jnp.tanh(0.5 * z) + 0.5).astype(o_ref.dtype)


def binary_classifier_forward(x, weight, bias, *, max_block_rows=4096):
    """Equivalent of BinaryClassifier.forward: sigmoid(x @ weight.T + bias).

    Args:
      x:      [B, 2] float32
      weight: [1, 2] float32 (PyTorch nn.Linear layout: [out_features, in_features])
      bias:   [1]    float32
      max_block_rows: rows (of 128 samples each) per grid block; multiple of 8.
    Returns:
      [B, 1] float32
    """
    B, F = x.shape
    assert F == 2, "BinaryClassifier expects 2 input features"
    assert max_block_rows % 8 == 0

    rows = pl.cdiv(B, _LANES)          # 128 samples per packed row
    if rows <= 8:
        R = 8                          # single well-tiled block for tiny batches
    else:
        # >= 2 blocks when possible (v7x megacore), 8-aligned, capped by VMEM budget.
        R = min(max_block_rows, _round_up(pl.cdiv(rows, 2), 8))
    rows_pad = _round_up(rows, R)
    B_pad = rows_pad * _LANES

    x = x.astype(jnp.float32)
    if B_pad != B:                      # pad only when the batch is not block-aligned
        x = jnp.pad(x, ((0, B_pad - B), (0, 0)))
    # Free row-major reshape: row i holds samples i*128..i*128+127, features interleaved.
    xp = x.reshape(rows_pad, 2 * _LANES)

    # Folded-weight compaction matrix: P[2j, j] = w0, P[2j+1, j] = w1, else 0.
    w = weight.reshape(2).astype(jnp.float32)
    eye = jnp.eye(_LANES, dtype=jnp.float32)
    P = jnp.stack([w[0] * eye, w[1] * eye], axis=1).reshape(2 * _LANES, _LANES)
    b = bias.reshape(1).astype(jnp.float32)

    grid = (rows_pad // R,)
    out = pl.pallas_call(
        _binary_classifier_kernel,
        out_shape=jax.ShapeDtypeStruct((rows_pad, _LANES), jnp.float32),
        grid=grid,
        in_specs=[
            pl.BlockSpec(memory_space=pltpu.MemorySpace.SMEM),        # bias scalar
            pl.BlockSpec((2 * _LANES, _LANES), lambda i: (0, 0)),     # P (resident)
            pl.BlockSpec((R, 2 * _LANES), lambda i: (i, 0)),          # packed x block
        ],
        out_specs=pl.BlockSpec((R, _LANES), lambda i: (i, 0)),        # dense output
        compiler_params=pltpu.CompilerParams(
            dimension_semantics=("parallel",),
            vmem_limit_bytes=32 * 1024 * 1024,
        ),
    )(b, P, xp)

    # Free reshape + final slice of the valid batch region.
    return out.reshape(B_pad)[:B].reshape(B, 1)


if __name__ == "__main__":
    key = jax.random.PRNGKey(0)
    k_x, k_w, k_b = jax.random.split(key, 3)

    # Small deterministic example consistent with nn.Linear(2, 1): batch=8.
    B, IN_F, OUT_F = 8, 2, 1
    x = jax.random.normal(k_x, (B, IN_F), dtype=jnp.float32)

    # PyTorch-style uniform(-1/sqrt(in), 1/sqrt(in)) parameter init.
    bound = 1.0 / jnp.sqrt(jnp.float32(IN_F))
    weight = jax.random.uniform(k_w, (OUT_F, IN_F), jnp.float32, -bound, bound)
    bias = jax.random.uniform(k_b, (OUT_F,), jnp.float32, -bound, bound)

    out = jax.block_until_ready(binary_classifier_forward(x, weight, bias))
    ref = jax.nn.sigmoid(x @ weight.T + bias)
    assert out.shape == (B, OUT_F)
    assert jnp.allclose(out, ref, atol=2e-3, rtol=2e-3)

    # Secondary check exercising the multi-block grid path (padding + grid > 1 + resident P).
    B2 = 5000
    x2 = jax.random.normal(jax.random.PRNGKey(1), (B2, IN_F), dtype=jnp.float32)
    out2 = jax.block_until_ready(
        binary_classifier_forward(x2, weight, bias, max_block_rows=16))
    ref2 = jax.nn.sigmoid(x2 @ weight.T + bias)
    assert out2.shape == (B2, OUT_F)
    assert jnp.allclose(out2, ref2, atol=2e-3, rtol=2e-3)

    print("KERNEL_OK")
</pallas_src>

<mosaic_0001>
module attributes {stable_mosaic.version = 11 : i64} {
  func.func @_binary_classifier_kernel(%arg0: i32, %arg1: memref<1xf32, #tpu.memory_space<smem>>, %arg2: memref<256x128xf32, #tpu.memory_space<vmem>>, %arg3: memref<8x256xf32, #tpu.memory_space<vmem>>, %arg4: memref<8x128xf32, #tpu.memory_space<vmem>>) attributes {dimension_semantics = [#tpu.dimension_semantics<parallel>], iteration_bounds = array<i64: 1>, scalar_prefetch = 0 : i64, scratch_operands = 0 : i64, tpu.core_type = #tpu.core_type<tc>, window_params = [{transform_indices = @transform_0, window_bounds = array<i64: 1>}, {pipeline_mode = #tpu.pipeline_mode<synchronous>, transform_indices = @transform_1, window_bounds = array<i64: 256, 128>}, {transform_indices = @transform_2, window_bounds = array<i64: 8, 256>}, {transform_indices = @transform_3, window_bounds = array<i64: 8, 128>}]} {
    %c0 = arith.constant 0 : index
    %c0_0 = arith.constant 0 : index
    %0 = vector.load %arg3[%c0, %c0_0] : memref<8x256xf32, #tpu.memory_space<vmem>>, vector<8x256xf32>
    %c0_1 = arith.constant 0 : index
    %c0_2 = arith.constant 0 : index
    %1 = vector.load %arg2[%c0_1, %c0_2] : memref<256x128xf32, #tpu.memory_space<vmem>>, vector<256x128xf32>
    %cst = arith.constant dense<0.000000e+00> : vector<8x128xf32>
    %2 = tpu.matmul %0, %1, %cst {dimension_numbers = #tpu.dot_dimension_numbers<[1], [0], [0], [1], [0, 0, 1, 1], [], []>, precision = #tpu.contract_precision<fp32>} : vector<8x256xf32>, vector<256x128xf32>, vector<8x128xf32> -> vector<8x128xf32>
    %c0_3 = arith.constant 0 : index
    %3 = memref.load %arg1[%c0_3] : memref<1xf32, #tpu.memory_space<smem>>
    %4 = vector.broadcast %3 : f32 to vector<8x128xf32>
    %5 = arith.addf %2, %4 : vector<8x128xf32>
    %cst_4 = arith.constant 5.000000e-01 : f32
    %6 = vector.broadcast %cst_4 : f32 to vector<8x128xf32>
    %7 = arith.mulf %6, %5 : vector<8x128xf32>
    %8 = math.tanh %7 : vector<8x128xf32>
    %cst_5 = arith.constant 5.000000e-01 : f32
    %9 = vector.broadcast %cst_5 : f32 to vector<8x128xf32>
    %10 = arith.mulf %9, %8 : vector<8x128xf32>
    %cst_6 = arith.constant 5.000000e-01 : f32
    %11 = vector.broadcast %cst_6 : f32 to vector<8x128xf32>
    %12 = arith.addf %10, %11 : vector<8x128xf32>
    %c0_7 = arith.constant 0 : index
    %c0_8 = arith.constant 0 : index
    %13 = vector.load %arg4[%c0_7, %c0_8] : memref<8x128xf32, #tpu.memory_space<vmem>>, vector<8x128xf32>
    tpu.vector_store %arg4[%c0_7, %c0_8], %12 {strides = array<i32>} : memref<8x128xf32, #tpu.memory_space<vmem>>, vector<8x128xf32>,
    return
  }
  func.func @transform_0(%arg0: i32) -> i32 {
    %c0_i32 = arith.constant 0 : i32
    %c0_i32_0 = arith.constant 0 : i32
    return %c0_i32 : i32
  }
  func.func @transform_1(%arg0: i32) -> (i32, i32) {
    %c0_i32 = arith.constant 0 : i32
    %c0_i32_0 = arith.constant 0 : i32
    %c0_i32_1 = arith.constant 0 : i32
    return %c0_i32, %c0_i32_0 : i32, i32
  }
  func.func @transform_2(%arg0: i32) -> (i32, i32) {
    %c0_i32 = arith.constant 0 : i32
    %c0_i32_0 = arith.constant 0 : i32
    return %arg0, %c0_i32 : i32, i32
  }
  func.func @transform_3(%arg0: i32) -> (i32, i32) {
    %c0_i32 = arith.constant 0 : i32
    %c0_i32_0 = arith.constant 0 : i32
    return %arg0, %c0_i32 : i32, i32
  }
}

</mosaic_0001>

<bundles_post_ra>
// kernel: tpu_custom_call.1
= control target key start
LH: loop header
LB: loop body
LE: loop exit
PB: predicated region body
PF: predicated region fallthrough
CT: control target
= control target key end

     0   :  { %9 = vsyncpa [#allocation4], 0  ;;  %s1904_s0 = inlined_call_operand.<no memory space> [shape: f32[1], index: 0, kind: input, shape index: {}]   ;;  %s1905_s1 = inlined_call_operand.hbm [shape: f32[256,128], index: 1, kind: input, shape index: {}]   ;;  %s1906_s2 = inlined_call_operand.hbm [shape: f32[8,256], index: 2, kind: input, shape index: {}]   ;;  %s1907_s3 = inlined_call_operand.hbm [shape: f32[8,128], index: 3, kind: output, shape index: {}]  }
   0x1   :  { %10 = vsyncpa [#allocation7], 0 }
   0x2   :  { %11 = vsyncpa [#allocation5], 0  ;;  %s1442_s12 = smov [#allocation3]   ;;  %s1370_s16 = scalar_lea.hbm %s1905_s1, 4096 }
   0x3   :  { %s19_s13 = sshll.u32 %s1442_s12, 4  ;;  %p1371_p0 = scmp.ne.s32.totalorder %s1905_s1, %s1370_s16  ;;  %s20_s13 = int_to_ptr.vmem [resolvable:$true] %s19_s13 }
   0x4   :  { %p1374_p1 = scmp.lt.u32.totalorder %s1370_s16, %s1905_s1 }
   0x6   :  { %p1376_p2 = pnand %p1374_p1, %p1371_p0 }
   0x8   :  { %1379 = shalt.err (!%p1376_p2)
}
   0x9   :  { %s1380_s21 = scalar_lea.vmem %s20_s13, 4096  ;;  %p1385_p4 = scmp.lt.s32.totalorder %s20_s13, %s20_s13 }
   0xa   :  { %p1381_p3 = scmp.ne.s32.totalorder %s20_s13, %s1380_s21  ;;  %p1386_p5 = scmp.lt.s32.totalorder %s1380_s21, %s1380_s21 }
   0xc   :  { %p1387_p6 = por %p1386_p5, %p1385_p4 }
   0xe   :  { %p1388_p7 = pnand %p1387_p6, %p1381_p3 }
  0x10   :  { %1391 = shalt.err (!%p1388_p7)
}
  0x11   :  { %s1443_s22 = smov 128   ;;  %s1444_s23 = smov 8  }
  0x12   :  { %25 = dma.hbm_to_vmem [thread:$0]  %s1905_s1, 4096, %s20_s13, [#allocation4], %s1443_s22, %s1443_s22, %s1444_s23  }
  0x13   :  { %s1445_s26 = smov [#allocation6]   ;;  %s1392_s30 = scalar_lea.hbm %s1906_s2, 256 }
  0x14   :  { %s32_s27 = sshll.u32 %s1445_s26, 4  ;;  %p1393_p8 = scmp.ne.s32.totalorder %s1906_s2, %s1392_s30  ;;  %s33_s27 = int_to_ptr.vmem [resolvable:$true] %s32_s27 }
  0x15   :  { %p1396_p9 = scmp.lt.u32.totalorder %s1392_s30, %s1906_s2 }
  0x17   :  { %p1398_p10 = pnand %p1396_p9, %p1393_p8 }
  0x19   :  { %1401 = shalt.err (!%p1398_p10)
}
  0x1a   :  { %s1402_s8 = scalar_lea.vmem %s33_s27, 256  ;;  %p1407_p12 = scmp.lt.s32.totalorder %s33_s27, %s33_s27 }
  0x1b   :  { %p1403_p11 = scmp.ne.s32.totalorder %s33_s27, %s1402_s8  ;;  %p1408_p13 = scmp.lt.s32.totalorder %s1402_s8, %s1402_s8 }
  0x1d   :  { %p1409_p0 = por %p1408_p13, %p1407_p12 }
  0x1f   :  { %p1410_p1 = pnand %p1409_p0, %p1403_p11 }
  0x21   :  { %1413 = shalt.err (!%p1410_p1)
}
  0x22   :  { %35 = dma.hbm_to_vmem [thread:$0]  %s1906_s2, 256, %s33_s27, [#allocation7]  }
  0x23   :  { %1436 = dma.done.wait [#allocation4], 4096  }
  0x24   :  { %1437 = vsyncadd [#allocation4], 4294963200 }
  0x25   :  { %1438 = dma.done.wait [#allocation7], 256  }
  0x26   :  { %1439 = vsyncadd [#allocation7], 4294967040  ;;  %v60_v0 = vld [vmem:[#allocation3 + $0x80] sm:$0xff]  ;;  %v61_v1 = vld [vmem:[#allocation3 + $0x88] sm:$0xff] }
  0x27   :  { %v44_v2 = vld [vmem:[#allocation3] sm:$0xff]  ;;  %v127_v3 = vand.u32 4294901760, %v60_v0  ;;  %v130_v4 = vand.u32 4294901760, %v61_v1  ;;  %v45_v5 = vld [vmem:[#allocation3 + $0x8] sm:$0xff]  ;;  %v62_v7 = vld [vmem:[#allocation3 + $0x90] sm:$0xff] }
  0x28   :  { %v79_v6 = vand.u32 4294901760, %v44_v2  ;;  %v63_v8 = vld [vmem:[#allocation3 + $0x98] sm:$0xff]  ;;  %v82_v9 = vand.u32 4294901760, %v45_v5  ;;  %v133_v10 = vand.u32 4294901760, %v62_v7  ;;  %v46_v12 = vld [vmem:[#allocation3 + $0x10] sm:$0xff]  ;;  %v64_v18 = vld [vmem:[#allocation3 + $0xa0] sm:$0xff] }
  0x29   :  { %v136_v11 = vand.u32 4294901760, %v63_v8  ;;  %v47_v13 = vld [vmem:[#allocation3 + $0x18] sm:$0xff]  ;;  %v1491_v14 = vpack.c.bf16 %v130_v4, %v127_v3  ;;  %v85_v16 = vand.u32 4294901760, %v46_v12  ;;  %v65_v19 = vld [vmem:[#allocation3 + $0xa8] sm:$0xff]  ;;  %v48_v23 = vld [vmem:[#allocation3 + $0x20] sm:$0xff]  ;;  %v139_v29 = vand.u32 4294901760, %v64_v18 }
  0x2a   :  { %v1493_v15 = vsub.f32 %v44_v2, %v79_v6  ;;  %v88_v17 = vand.u32 4294901760, %v47_v13  ;;  %v1495_v20 = vpack.c.bf16 %v82_v9, %v79_v6  ;;  %v1497_v21 = vsub.f32 %v45_v5, %v82_v9  ;;  %v49_v24 = vld [vmem:[#allocation3 + $0x28] sm:$0xff]  ;;  %v66_v37 = vld [vmem:[#allocation3 + $0xb0] sm:$0xff]  ;;  %v67_v42 = vld [vmem:[#allocation3 + $0xb8] sm:$0xff] }
  0x2b   :  { %v1499_v22 = vpack.c.bf16 %v136_v11, %v133_v10  ;;  %1172 = vmatprep.subr.bf16.mxu0 %v1491_v14  ;;  %v1502_v25 = vsub.f32 %v62_v7, %v133_v10  ;;  %v1504_v26 = vsub.f32 %v63_v8, %v136_v11  ;;  %v1508_v28 = vsub.f32 %v46_v12, %v85_v16  ;;  %v50_v55 = vld [vmem:[#allocation3 + $0x30] sm:$0xff]  ;;  %v51_v56 = vld [vmem:[#allocation3 + $0x38] sm:$0xff]  ;;  %v68_v5 = vld [vmem:[#allocation3 + $0xc0] sm:$0xff] }
  0x2c   :  { %v1506_v27 = vpack.c.bf16 %v88_v17, %v85_v16  ;;  %1174 = vmatpush3.bf16.msra.mxu0 %v1495_v20  ;;  %v142_v30 = vand.u32 4294901760, %v65_v19  ;;  %v1511_v31 = vsub.f32 %v60_v0, %v127_v3  ;;  %v1513_v32 = vsub.f32 %v61_v1, %v130_v4  ;;  %v69_v6 = vld [vmem:[#allocation3 + $0xc8] sm:$0xff]  ;;  %v52_v11 = vld [vmem:[#allocation3 + $0x40] sm:$0xff] }
  0x2d   :  { %1176 = vmatprep.subr.bf16.mxu0 %v1499_v22  ;;  %v91_v33 = vand.u32 4294901760, %v48_v23  ;;  %v94_v34 = vand.u32 4294901760, %v49_v24  ;;  %v1923_v35 = vand.u32 4294901760, %v1493_v15  ;;  %v1922_v36 = vand.u32 4294901760, %v1497_v21 }
  0x2e   :  { %v1518_v38 = vsub.f32 %v47_v13, %v88_v17  ;;  %v1520_v39 = vpack.c.bf16 %v142_v30, %v139_v29  ;;  %v1522_v40 = vsub.f32 %v64_v18, %v139_v29  ;;  %v1927_v41 = vand.u32 4294901760, %v1511_v31  ;;  %v53_v29 = vld [vmem:[#allocation3 + $0x48] sm:$0xff] }
  0x2f   :  { %v1525_v43 = vsub.f32 %v65_v19, %v142_v30  ;;  %v1925_v44 = vand.u32 4294901760, %v1513_v32  ;;  %v1528_v45 = vpack.c.bf16 %v94_v34, %v91_v33  ;;  %v1530_v46 = vsub.f32 %v48_v23, %v91_v33 }
  0x30   :  { %1178 = vmatpush3.bf16.msra.mxu0 %v1506_v27  ;;  %v306_v47 = vsub.f32 %v1511_v31, %v1927_v41  ;;  %v194_v48 = vsub.f32 %v1493_v15, %v1923_v35  ;;  %v201_v49 = vsub.f32 %v1497_v21, %v1922_v36  ;;  %v145_v50 = vand.u32 4294901760, %v66_v37  ;;  %v43_v41 = vld [vmem:[#allocation6 + $0x8] sm:$0xff] }
  0x31   :  { %1180 = vmatprep.subr.bf16.mxu0 %v1520_v39  ;;  %v313_v51 = vsub.f32 %v1513_v32, %v1925_v44  ;;  %v148_v52 = vand.u32 4294901760, %v67_v42  ;;  %v1920_v53 = vand.u32 4294901760, %v1502_v25  ;;  %v1918_v54 = vand.u32 4294901760, %v1504_v26 }
  0x32   :  { %v307_v57 = vand.u32 4294901760, %v306_v47  ;;  %v1548_v58 = vsub.f32 %v49_v24, %v94_v34  ;;  %v195_v59 = vand.u32 4294901760, %v194_v48  ;;  %v202_v60 = vand.u32 4294901760, %v201_v49 }
  0x33   :  { %v314_v61 = vand.u32 4294901760, %v313_v51  ;;  %v1550_v62 = vpack.c.bf16 %v148_v52, %v145_v50  ;;  %v1552_v63 = vsub.f32 %v66_v37, %v145_v50  ;;  %v320_v0 = vsub.f32 %v1502_v25, %v1920_v53 }
  0x34   :  { %1182 = vmatpush3.bf16.msra.mxu0 %v1528_v45  ;;  %v1205_v1 = vpack.c.bf16 %v202_v60, %v195_v59  ;;  %v327_v2 = vsub.f32 %v1504_v26, %v1918_v54  ;;  %v97_v3 = vand.u32 4294901760, %v50_v55  ;;  %v100_v4 = vand.u32 4294901760, %v51_v56  ;;  %v71_v59 = vld [vmem:[#allocation3 + $0xd8] sm:$0xff] }
  0x35   :  { %v1203_v7 = vpack.c.bf16 %v314_v61, %v307_v57  ;;  %1184 = vmatprep.subr.bf16.mxu0 %v1550_v62  ;;  %v321_v8 = vand.u32 4294901760, %v320_v0  ;;  %v1917_v9 = vand.u32 4294901760, %v1508_v28  ;;  %v1915_v10 = vand.u32 4294901760, %v1518_v38  ;;  %v70_v57 = vld [vmem:[#allocation3 + $0xd0] sm:$0xff]  ;;  %v75_v54 = vld [vmem:[#allocation3 + $0xf8] sm:$0xff] }
  0x36   :  { %v1564_v12 = vsub.f32 %v67_v42, %v148_v52  ;;  %v328_v13 = vand.u32 4294901760, %v327_v2  ;;  %v1566_v16 = vpack.c.bf16 %v100_v4, %v97_v3  ;;  %v1568_v17 = vsub.f32 %v50_v55, %v97_v3 }
  0x37   :  { %1204 = vmatprep.subr.bf16.mxu1 %v1203_v7  ;;  %v208_v18 = vsub.f32 %v1508_v28, %v1917_v9  ;;  %v215_v19 = vsub.f32 %v1518_v38, %v1915_v10  ;;  %v151_v23 = vand.u32 4294901760, %v68_v5  ;;  %v154_v24 = vand.u32 4294901760, %v69_v6  ;;  %v74_v9 = vld [vmem:[#allocation3 + $0xf0] sm:$0xff] }
  0x38   :  { %1206 = vmatpush3.bf16.msra.mxu1 %v1205_v1  ;;  %v1207_v30 = vpack.c.bf16 %v328_v13, %v321_v8  ;;  %1186 = vmatpush3.bf16.msra.mxu0 %v1566_v16  ;;  %v1913_v33 = vand.u32 4294901760, %v1522_v40  ;;  %v1912_v34 = vand.u32 4294901760, %v1525_v43  ;;  %v103_v37 = vand.u32 4294901760, %v52_v11  ;;  %v54_v1 = vld [vmem:[#allocation3 + $0x50] sm:$0xff] }
  0x39   :  { %v1579_v42 = vsub.f32 %v51_v56, %v100_v4  ;;  %v209_v47 = vand.u32 4294901760, %v208_v18  ;;  %v216_v48 = vand.u32 4294901760, %v215_v19  ;;  %v1581_v49 = vpack.c.bf16 %v154_v24, %v151_v23  ;;  %v55_v18 = vld [vmem:[#allocation3 + $0x58] sm:$0xff] }
  0x3a   :  { %1208 = vmatprep.subr.bf16.mxu1 %v1207_v30  ;;  %v1583_v50 = vsub.f32 %v68_v5, %v151_v23  ;;  %v334_v51 = vsub.f32 %v1522_v40, %v1913_v33  ;;  %v341_v52 = vsub.f32 %v1525_v43, %v1912_v34  ;;  %v106_v55 = vand.u32 4294901760, %v53_v29 }
  0x3b   :  { %v1209_v56 = vpack.c.bf16 %v216_v48, %v209_v47  ;;  %1188 = vmatprep.subr.bf16.mxu0 %v1581_v49  ;;  %v1592_v60 = vsub.f32 %v69_v6, %v154_v24  ;;  %v1910_v61 = vand.u32 4294901760, %v1530_v46  ;;  %v1908_v0 = vand.u32 4294901760, %v1548_v58 }
  0x3c   :  { %v335_v2 = vand.u32 4294901760, %v334_v51  ;;  %v342_v3 = vand.u32 4294901760, %v341_v52  ;;  %v1596_v4 = vpack.c.bf16 %v106_v55, %v103_v37  ;;  %v1598_v5 = vsub.f32 %v52_v11, %v103_v37 }
  0x3d   :  { %1210 = vmatpush3.bf16.msra.mxu1 %v1209_v56  ;;  %v222_v7 = vsub.f32 %v1530_v46, %v1910_v61  ;;  %v229_v6 = vsub.f32 %v1548_v58, %v1908_v0  ;;  %v157_v8 = vand.u32 4294901760, %v70_v57  ;;  %v160_v13 = vand.u32 4294901760, %v71_v59  ;;  %v73_v0 = vld [vmem:[#allocation3 + $0xe8] sm:$0xff] }
  0x3e   :  { %v1211_v19 = vpack.c.bf16 %v342_v3, %v335_v2  ;;  %1190 = vmatpush3.bf16.msra.mxu0 %v1596_v4  ;;  %v1909_v23 = vand.u32 4294901760, %v1552_v63  ;;  %v1911_v11 = vand.u32 4294901760, %v1564_v12  ;;  %v109_v24 = vand.u32 4294901760, %v54_v1  ;;  %v72_v3 = vld [vmem:[#allocation3 + $0xe0] sm:$0xff] }
  0x3f   :  { %v1609_v30 = vsub.f32 %v53_v29, %v106_v55  ;;  %v223_v37 = vand.u32 4294901760, %v222_v7  ;;  %v230_v47 = vand.u32 4294901760, %v229_v6  ;;  %v1611_v48 = vpack.c.bf16 %v160_v13, %v157_v8  ;;  %v56_v6 = vld [vmem:[#allocation3 + $0x60] sm:$0xff] }
  0x40   :  { %1212 = vmatprep.subr.bf16.mxu1 %v1211_v19  ;;  %v1613_v51 = vsub.f32 %v70_v57, %v157_v8  ;;  %v348_v52 = vsub.f32 %v1552_v63, %v1909_v23  ;;  %v355_v56 = vsub.f32 %v1564_v12, %v1911_v11  ;;  %v112_v2 = vand.u32 4294901760, %v55_v18  ;;  %v57_v11 = vld [vmem:[#allocation3 + $0x68] sm:$0xff] }
  0x41   :  { %v1213_v29 = vpack.c.bf16 %v230_v47, %v223_v37  ;;  %1192 = vmatprep.subr.bf16.mxu0 %v1611_v48  ;;  %v1622_v55 = vsub.f32 %v71_v59, %v160_v13  ;;  %v1914_v7 = vand.u32 4294901760, %v1568_v17  ;;  %v1916_v57 = vand.u32 4294901760, %v1579_v42 }
  0x42   :  { %v349_v8 = vand.u32 4294901760, %v348_v52  ;;  %v356_v19 = vand.u32 4294901760, %v355_v56  ;;  %v1626_v23 = vpack.c.bf16 %v112_v2, %v109_v24  ;;  %v1628_v61 = vsub.f32 %v54_v1, %v109_v24 }
  0x43   :  { %1214 = vmatpush3.bf16.msra.mxu1 %v1213_v29  ;;  %v236_v37 = vsub.f32 %v1568_v17, %v1914_v7  ;;  %v243_v59 = vsub.f32 %v1579_v42, %v1916_v57  ;;  %v163_v13 = vand.u32 4294901760, %v72_v3  ;;  %v166_v47 = vand.u32 4294901760, %v73_v0 }
  0x44   :  { %1953 = vst [vmem:[#allocation12_spill] sm:$0xff] %v1626_v23  ;;  %v1215_v34 = vpack.c.bf16 %v356_v19, %v349_v8  ;;  %1194 = vmatpush3.bf16.msra.mxu0 %v1626_v23  ;;  %v1919_v52 = vand.u32 4294901760, %v1583_v50  ;;  %v1921_v1 = vand.u32 4294901760, %v1592_v60  ;;  %v115_v24 = vand.u32 4294901760, %v56_v6 }
  0x45   :  { %v1639_v56 = vsub.f32 %v55_v18, %v112_v2  ;;  %v237_v29 = vand.u32 4294901760, %v236_v37  ;;  %v244_v33 = vand.u32 4294901760, %v243_v59  ;;  %v1641_v7 = vpack.c.bf16 %v166_v47, %v163_v13  ;;  %v58_v37 = vld [vmem:[#allocation3 + $0x70] sm:$0xff] }
  0x46   :  { %1216 = vmatprep.subr.bf16.mxu1 %v1215_v34  ;;  %v1643_v10 = vsub.f32 %v72_v3, %v163_v13  ;;  %v362_v8 = vsub.f32 %v1583_v50, %v1919_v52  ;;  %v369_v19 = vsub.f32 %v1592_v60, %v1921_v1  ;;  %v118_v57 = vand.u32 4294901760, %v57_v11  ;;  %v59_v1 = vld [vmem:[#allocation3 + $0x78] sm:$0xff] }
  0x47   :  { %1954 = vst [vmem:[#allocation13_spill] sm:$0xff] %v1641_v7  ;;  %v1217_v18 = vpack.c.bf16 %v244_v33, %v237_v29  ;;  %1196 = vmatprep.subr.bf16.mxu0 %v1641_v7  ;;  %v1652_v2 = vsub.f32 %v73_v0, %v166_v47  ;;  %v1924_v34 = vand.u32 4294901760, %v1598_v5  ;;  %v1926_v3 = vand.u32 4294901760, %v1609_v30 }
  0x48   :  { %v363_v59 = vand.u32 4294901760, %v362_v8  ;;  %v370_v13 = vand.u32 4294901760, %v369_v19  ;;  %v1656_v52 = vpack.c.bf16 %v118_v57, %v115_v24  ;;  %v1658_v53 = vsub.f32 %v56_v6, %v115_v24 }
  0x49   :  { %1218 = vmatpush3.bf16.msra.mxu1 %v1217_v18  ;;  %v250_v33 = vsub.f32 %v1598_v5, %v1924_v34  ;;  %v257_v0 = vsub.f32 %v1609_v30, %v1926_v3  ;;  %v169_v47 = vand.u32 4294901760, %v74_v9  ;;  %v172_v29 = vand.u32 4294901760, %v75_v54 }
  0x4a   :  { %1955 = vst [vmem:[#allocation14_spill] sm:$0xff] %v1656_v52  ;;  %v1219_v36 = vpack.c.bf16 %v370_v13, %v363_v59  ;;  %1198 = vmatpush3.bf16.msra.mxu0 %v1656_v52  ;;  %v1930_v8 = vand.u32 4294901760, %v1613_v51  ;;  %v1931_v6 = vand.u32 4294901760, %v1622_v55  ;;  %v121_v24 = vand.u32 4294901760, %v58_v37 }
  0x4b   :  { %v1669_v19 = vsub.f32 %v57_v11, %v118_v57  ;;  %v251_v18 = vand.u32 4294901760, %v250_v33  ;;  %v258_v35 = vand.u32 4294901760, %v257_v0  ;;  %v1671_v34 = vpack.c.bf16 %v172_v29, %v169_v47 }
  0x4c   :  { %1220 = vmatprep.subr.bf16.mxu1 %v1219_v36  ;;  %v1673_v44 = vsub.f32 %v74_v9, %v169_v47  ;;  %v376_v59 = vsub.f32 %v1613_v51, %v1930_v8  ;;  %v383_v13 = vsub.f32 %v1622_v55, %v1931_v6  ;;  %v124_v3 = vand.u32 4294901760, %v59_v1  ;;  %v42_v9 = vld [vmem:[#allocation6] sm:$0xff] }
  0x4d   :  { %1956 = vst [vmem:[#allocation15_spill] sm:$0xff] %v1671_v34  ;;  %v1221_v52 = vpack.c.bf16 %v258_v35, %v251_v18  ;;  %1200 = vmatprep.subr.bf16.mxu0 %v1671_v34  ;;  %v1682_v11 = vsub.f32 %v75_v54, %v172_v29  ;;  %v1932_v57 = vand.u32 4294901760, %v1628_v61  ;;  %v1933_v36 = vand.u32 4294901760, %v1639_v56 }
  0x4e   :  { %v377_v33 = vand.u32 4294901760, %v376_v59  ;;  %v384_v0 = vand.u32 4294901760, %v383_v13  ;;  %v1686_v47 = vpack.c.bf16 %v124_v3, %v121_v24  ;;  %v1688_v8 = vsub.f32 %v58_v37, %v121_v24 }
  0x4f   :  { %1222 = vmatpush3.bf16.msra.mxu1 %v1221_v52  ;;  %v264_v35 = vsub.f32 %v1628_v61, %v1932_v57  ;;  %v271_v54 = vsub.f32 %v1639_v56, %v1933_v36  ;;  %v1696_v29 = vand.u32 4294901760, %v43_v41  ;;  %v1936_v18 = vand.u32 4294901760, %v1643_v10 }
  0x50   :  { %1957 = vst [vmem:[#allocation16_spill] sm:$0xff] %v1686_v47  ;;  %v1223_v6 = vpack.c.bf16 %v384_v0, %v377_v33  ;;  %1202 = vmatpush3.bf16.msra.mxu0 %v1686_v47  ;;  %v1942_v59 = vand.u32 4294901760, %v1652_v2  ;;  %v1235_v52 = vpack.c.bf16 %v1513_v32, %v1511_v31  ;;  %v1703_v37 = vand.u32 4294901760, %v42_v9 }
  0x51   :  { %1958 = vst [vmem:[#allocation17_spill] sm:$0xff] %v1696_v29  ;;  %v265_v24 = vand.u32 4294901760, %v264_v35  ;;  %v272_v13 = vand.u32 4294901760, %v271_v54  ;;  %v1706_v57 = vsub.f32 %v43_v41, %v1696_v29  ;;  %v390_v36 = vsub.f32 %v1643_v10, %v1936_v18  ;;  %415 = vmatprep.mubr.f32.mxu1 %v1696_v29 }
  0x52   :  { %1224 = vmatprep.subr.bf16.mxu1 %v1223_v6  ;;  %v397_v33 = vsub.f32 %v1652_v2, %v1942_v59  ;;  %1236 = vmatprep.subr.bf16.mxu0 %v1235_v52  ;;  %v1716_v0 = vsub.f32 %v42_v9, %v1703_v37  ;;  %v1941_v35 = vand.u32 4294901760, %v1658_v53  ;;  %v1943_v41 = vand.u32 4294901760, %v1669_v19 }
  0x53   :  { %v1720_v54 = vsub.f32 %v59_v1, %v124_v3  ;;  %v1225_v47 = vpack.c.bf16 %v272_v13, %v265_v24  ;;  %v1944_v18 = vand.u32 4294901760, %v1706_v57  ;;  %v391_v34 = vand.u32 4294901760, %v390_v36 }
  0x54   :  { %v398_v29 = vand.u32 4294901760, %v397_v33  ;;  %v182_v6 = vand.u32 4294901760, %v1716_v0  ;;  %v278_v52 = vsub.f32 %v1658_v53, %v1941_v35  ;;  %v285_v9 = vsub.f32 %v1669_v19, %v1943_v41 }
  0x55   :  { %1226 = vmatpush3.bf16.msra.mxu1 %v1225_v47  ;;  %v177_v1 = vsub.f32 %v1706_v57, %v1944_v18  ;;  %v1237_v3 = vpack.c.bf16 %v1497_v21, %v1493_v15  ;;  %v1949_v36 = vand.u32 4294901760, %v1673_v44  ;;  %v1952_v24 = vand.u32 4294901760, %v1682_v11 }
  0x56   :  { %v1227_v13 = vpack.c.bf16 %v398_v29, %v391_v34  ;;  %v183_v33 = vsub.f32 %v1716_v0, %v182_v6  ;;  %v279_v35 = vand.u32 4294901760, %v278_v52  ;;  %v286_v59 = vand.u32 4294901760, %v285_v9 }
  0x57   :  { %v178_v41 = vand.u32 4294901760, %v177_v1  ;;  %v404_v47 = vsub.f32 %v1673_v44, %v1949_v36  ;;  %v411_v18 = vsub.f32 %v1682_v11, %v1952_v24  ;;  %v1951_v7 = vand.u32 4294901760, %v1688_v8 }
  0x58   :  { %1228 = vmatprep.subr.bf16.mxu1 %v1227_v13  ;;  %v184_v23 = vand.u32 4294901760, %v183_v33  ;;  %v1229_v34 = vpack.c.bf16 %v286_v59, %v279_v35  ;;  %v1239_v29 = vpack.c.bf16 %v1504_v26, %v1502_v25  ;;  %v1950_v52 = vand.u32 4294901760, %v1720_v54 }
  0x59   :  { %179 = vmatprep.mubr.f32.mxu0 %v178_v41  ;;  %v405_v9 = vand.u32 4294901760, %v404_v47  ;;  %v412_v1 = vand.u32 4294901760, %v411_v18  ;;  %v292_v36 = vsub.f32 %v1688_v8, %v1951_v7  ;;  %v1241_v33 = vpack.c.bf16 %v1518_v38, %v1508_v28 }
  0x5a   :  { %185 = vmatmul.mubr.f32.vlgmr.msra.gmra.mrb[0].mxu0 %v184_v23  ;;  %1230 = vmatpush3.bf16.msra.mxu1 %v1229_v34  ;;  %v299_v13 = vsub.f32 %v1720_v54, %v1950_v52  ;;  %v1243_v41 = vpack.c.bf16 %v1525_v43, %v1522_v40  ;;  %v1245_v23 = vpack.c.bf16 %v1548_v58, %v1530_v46  ;;  %v1960_v34 = vand.u32 4294901760, %v1513_v32 }
  0x5b   :  { %1238 = vmatpush3.bf16.msra.mxu0 %v1237_v3  ;;  %v1231_v59 = vpack.c.bf16 %v412_v1, %v405_v9  ;;  %v293_v35 = vand.u32 4294901760, %v292_v36  ;;  %552 = vmatprep.mubr.f32.mxu0 %v1706_v57  ;;  %v1247_v47 = vpack.c.bf16 %v1564_v12, %v1552_v63  ;;  %v1959_v36 = vand.u32 4294901760, %v1511_v31 }
  0x5c   :  { %1240 = vmatprep.subr.bf16.mxu0 %v1239_v29  ;;  %v300_v18 = vand.u32 4294901760, %v299_v13  ;;  %v1961_v1 = vand.u32 4294901760, %v1493_v15  ;;  %v1962_v29 = vand.u32 4294901760, %v1497_v21  ;;  %v1963_v52 = vand.u32 4294901760, %v1502_v25 }
  0x5d   :  { %1232 = vmatprep.subr.bf16.mxu1 %v1231_v59  ;;  %v1299_v9 = vpack.c.bf16 %v1960_v34, %v1959_v36  ;;  %v1964_v59 = vand.u32 4294901760, %v1504_v26  ;;  %v1965_v24 = vand.u32 4294901760, %v1508_v28  ;;  %v1967_v31 = vand.u32 4294901760, %v1522_v40 }
  0x5e   :  { %v1233_v3 = vpack.c.bf16 %v300_v18, %v293_v35  ;;  %v1301_v13 = vpack.c.bf16 %v1962_v29, %v1961_v1  ;;  %v1966_v35 = vand.u32 4294901760, %v1518_v38  ;;  %v1968_v32 = vand.u32 4294901760, %v1525_v43  ;;  %v1983_v29 = vld [vmem:[#allocation14_spill] sm:$0xff] }
  0x5f   :  { %v1303_v7 = vpack.c.bf16 %v1964_v59, %v1963_v52  ;;  %1242 = vmatpush3.bf16.msra.mxu0 %v1241_v33  ;;  %v1969_v15 = vand.u32 4294901760, %v1530_v46  ;;  %v1970_v21 = vand.u32 4294901760, %v1548_v58  ;;  %v1971_v25 = vand.u32 4294901760, %v1552_v63  ;;  %v1984_v59 = vld [vmem:[#allocation15_spill] sm:$0xff] }
  0x60   :  { %v1305_v18 = vpack.c.bf16 %v1966_v35, %v1965_v24  ;;  %v1307_v36 = vpack.c.bf16 %v1968_v32, %v1967_v31  ;;  %v1972_v26 = vand.u32 4294901760, %v1564_v12  ;;  %1234 = vmatpush3.bf16.msra.mxu1 %v1233_v3  ;;  %1244 = vmatprep.subr.bf16.mxu0 %v1243_v41  ;;  %v1973_v28 = vand.u32 4294901760, %v1568_v17  ;;  %v1985_v35 = vld [vmem:[#allocation16_spill] sm:$0xff] }
  0x61   :  { %v1309_v34 = vpack.c.bf16 %v1970_v21, %v1969_v15  ;;  %v1974_v38 = vand.u32 4294901760, %v1579_v42  ;;  %v1975_v43 = vand.u32 4294901760, %v1583_v50  ;;  %v1976_v24 = vand.u32 4294901760, %v1592_v60  ;;  %1268 = vmatprep.subr.bf16.mxu1 %v1491_v14 }
  0x62   :  { %v1311_v52 = vpack.c.bf16 %v1972_v26, %v1971_v25  ;;  %v1977_v58 = vand.u32 4294901760, %v1598_v5  ;;  %v1978_v33 = vand.u32 4294901760, %v1609_v30  ;;  %v1249_v12 = vpack.c.bf16 %v1579_v42, %v1568_v17 }
  0x63   :  { %v1313_v40 = vpack.c.bf16 %v1974_v38, %v1973_v28  ;;  %v1315_v46 = vpack.c.bf16 %v1976_v24, %v1975_v43  ;;  %417 = vmatmul.mubr.f32.vlgmr.msra.gmra.mrb[0].mxu1 %v1703_v37  ;;  %1246 = vmatpush3.bf16.msra.mxu0 %v1245_v23  ;;  %v1251_v41 = vpack.c.bf16 %v1592_v60, %v1583_v50  ;;  %v1979_v3 = vand.u32 4294901760, %v1706_v57  ;;  %v1980_v57 = vld [vmem:[#allocation12_spill] sm:$0xff]  ;;  %v1981_v23 = vld [vmem:[#allocation13_spill] sm:$0xff] }
  0x64   :  { %v1317_v63 = vpack.c.bf16 %v1978_v33, %v1977_v58  ;;  %1270 = vmatpush3.bf16.msra.mxu1 %v1495_v20  ;;  %1248 = vmatprep.subr.bf16.mxu0 %v1247_v47  ;;  %v1253_v1 = vpack.c.bf16 %v1609_v30, %v1598_v5  ;;  %v1255_v17 = vpack.c.bf16 %v1622_v55, %v1613_v51  ;;  %v1982_v47 = vld [vmem:[#allocation17_spill] sm:$0xff] }
  0x65   :  { %1272 = vmatprep.subr.bf16.mxu1 %v1499_v22  ;;  %659 = vmatprep.mubr.f32.mxu1 %v1979_v3  ;;  %v1257_v42 = vpack.c.bf16 %v1639_v56, %v1628_v61  ;;  %v1259_v50 = vpack.c.bf16 %v1652_v2, %v1643_v10  ;;  %v1261_v60 = vpack.c.bf16 %v1669_v19, %v1658_v53 }
  0x66   :  { %v1263_v5 = vpack.c.bf16 %v1682_v11, %v1673_v44  ;;  %v1265_v30 = vpack.c.bf16 %v1720_v54, %v1688_v8 }
  0x67   :  { %1250 = vmatpush3.bf16.msra.mxu0 %v1249_v12 }
  0x68   :  { %1274 = vmatpush3.bf16.msra.mxu1 %v1506_v27  ;;  %1252 = vmatprep.subr.bf16.mxu0 %v1251_v41 }
  0x69   :  { %1276 = vmatprep.subr.bf16.mxu1 %v1520_v39 }
  0x6b   :  { %1254 = vmatpush3.bf16.msra.mxu0 %v1253_v1 }
  0x6c   :  { %1278 = vmatpush3.bf16.msra.mxu1 %v1528_v45  ;;  %1256 = vmatprep.subr.bf16.mxu0 %v1255_v17 }
  0x6d   :  { %1280 = vmatprep.subr.bf16.mxu1 %v1550_v62 }
  0x6f   :  { %1258 = vmatpush3.bf16.msra.mxu0 %v1257_v42 }
  0x70   :  { %1282 = vmatpush3.bf16.msra.mxu1 %v1566_v16  ;;  %1260 = vmatprep.subr.bf16.mxu0 %v1259_v50 }
  0x71   :  { %1284 = vmatprep.subr.bf16.mxu1 %v1581_v49 }
  0x73   :  { %1262 = vmatpush3.bf16.msra.mxu0 %v1261_v60 }
  0x74   :  { %1286 = vmatpush3.bf16.msra.mxu1 %v1596_v4  ;;  %1264 = vmatprep.subr.bf16.mxu0 %v1263_v5 }
  0x75   :  { %1288 = vmatprep.subr.bf16.mxu1 %v1611_v48 }
  0x77   :  { %1266 = vmatpush3.bf16.msra.mxu0 %v1265_v30 }
  0x78   :  { %1290 = vmatpush3.bf16.msra.mxu1 %v1980_v57  ;;  %1300 = vmatprep.subr.bf16.mxu0 %v1299_v9  ;;  %v1987_v9 = vand.u32 4294901760, %v1622_v55 }
  0x79   :  { %1292 = vmatprep.subr.bf16.mxu1 %v1981_v23 }
  0x7a   :  { %555 = vmatmul.mubr.f32.vlgmr.msra.gmra.mrb[2].mxu0 %v1716_v0  ;;  %v1988_v0 = vand.u32 4294901760, %v1628_v61  ;;  %v1994_v61 = vand.u32 4294901760, %v1673_v44 }
  0x7b   :  { %1302 = vmatpush3.bf16.msra.mxu0 %v1301_v13  ;;  %829 = vmatprep.mubr.f32.mxu0 %v1982_v47 }
  0x7c   :  { %1294 = vmatpush3.bf16.msra.mxu1 %v1983_v29  ;;  %1304 = vmatprep.subr.bf16.mxu0 %v1303_v7  ;;  %v1986_v7 = vand.u32 4294901760, %v1613_v51  ;;  %v1992_v51 = vand.u32 4294901760, %v1658_v53 }
  0x7d   :  { %1296 = vmatprep.subr.bf16.mxu1 %v1984_v59 }
  0x7f   :  { %1306 = vmatpush3.bf16.msra.mxu0 %v1305_v18 }
  0x80   :  { %1298 = vmatpush3.bf16.msra.mxu1 %v1985_v35  ;;  %1308 = vmatprep.subr.bf16.mxu0 %v1307_v36 }
  0x81   :  { %1332 = vmatprep.subr.bf16.mxu1 %v1491_v14  ;;  %v1319_v14 = vpack.c.bf16 %v1987_v9, %v1986_v7 }
  0x83   :  { %663 = vmatmul.mubr.f32.vlgmr.msra.gmra.mrb[2].mxu1 %v182_v6  ;;  %1310 = vmatpush3.bf16.msra.mxu0 %v1309_v34 }
  0x84   :  { %1334 = vmatpush3.bf16.msra.mxu1 %v1495_v20  ;;  %1312 = vmatprep.subr.bf16.mxu0 %v1311_v52  ;;  %v1989_v20 = vand.u32 4294901760, %v1639_v56 }
  0x85   :  { %1336 = vmatprep.subr.bf16.mxu1 %v1499_v22  ;;  %933 = vmatprep.mubr.f32.mxu1 %v1982_v47  ;;  %v1990_v22 = vand.u32 4294901760, %v1643_v10  ;;  %v1996_v10 = vand.u32 4294901760, %v1688_v8 }
  0x86   :  { %v1321_v6 = vpack.c.bf16 %v1989_v20, %v1988_v0 }
  0x87   :  { %1314 = vmatpush3.bf16.msra.mxu0 %v1313_v40 }
  0x88   :  { %1338 = vmatpush3.bf16.msra.mxu1 %v1506_v27  ;;  %1316 = vmatprep.subr.bf16.mxu0 %v1315_v46  ;;  %v1991_v27 = vand.u32 4294901760, %v1652_v2 }
  0x89   :  { %1340 = vmatprep.subr.bf16.mxu1 %v1520_v39  ;;  %v1993_v39 = vand.u32 4294901760, %v1669_v19 }
  0x8a   :  { %v1323_v13 = vpack.c.bf16 %v1991_v27, %v1990_v22 }
  0x8b   :  { %1318 = vmatpush3.bf16.msra.mxu0 %v1317_v63  ;;  %v1325_v55 = vpack.c.bf16 %v1993_v39, %v1992_v51 }
  0x8c   :  { %1342 = vmatpush3.bf16.msra.mxu1 %v1528_v45  ;;  %1320 = vmatprep.subr.bf16.mxu0 %v1319_v14  ;;  %v1995_v45 = vand.u32 4294901760, %v1682_v11 }
  0x8d   :  { %1344 = vmatprep.subr.bf16.mxu1 %v1550_v62  ;;  %v1997_v62 = vand.u32 4294901760, %v1720_v54 }
  0x8e   :  { %v1327_v56 = vpack.c.bf16 %v1995_v45, %v1994_v61 }
  0x8f   :  { %1322 = vmatpush3.bf16.msra.mxu0 %v1321_v6  ;;  %v1329_v2 = vpack.c.bf16 %v1997_v62, %v1996_v10 }
  0x90   :  { %1346 = vmatpush3.bf16.msra.mxu1 %v1566_v16  ;;  %1324 = vmatprep.subr.bf16.mxu0 %v1323_v13 }
  0x91   :  { %1348 = vmatprep.subr.bf16.mxu1 %v1581_v49  ;;  %v77_v49 = vstv %s1904_s0  ;;  %s1446_s0 = smov [#allocation8]  }
  0x92   :  { %s951_s11 = sshll.u32 %s1446_s0, 4  ;;  %s952_s11 = int_to_ptr.vmem [resolvable:$true] %s951_s11 }
  0x93   :  { %1326 = vmatpush3.bf16.msra.mxu0 %v1325_v55  ;;  %s1414_s12 = scalar_lea.vmem %s952_s11, 128  ;;  %p1419_p3 = scmp.lt.s32.totalorder %s952_s11, %s952_s11 }
  0x94   :  { %1350 = vmatpush3.bf16.msra.mxu1 %v1596_v4  ;;  %1328 = vmatprep.subr.bf16.mxu0 %v1327_v56  ;;  %p1415_p2 = scmp.ne.s32.totalorder %s952_s11, %s1414_s12  ;;  %p1420_p4 = scmp.lt.s32.totalorder %s1414_s12, %s1414_s12 }
  0x95   :  { %1352 = vmatprep.subr.bf16.mxu1 %v1611_v48 }
  0x96   :  { %p1421_p5 = por %p1420_p4, %p1419_p3 }
  0x97   :  { %1330 = vmatpush3.bf16.msra.mxu0 %v1329_v2 }
  0x98   :  { %1354 = vmatpush3.bf16.msra.mxu1 %v1980_v57  ;;  %p1422_p6 = pnand %p1421_p5, %p1415_p2 }
  0x99   :  { %1356 = vmatprep.subr.bf16.mxu1 %v1981_v23 }
  0x9a   :  { %831 = vmatmul.mubr.f32.vlgmr.msra.gmra.mrb[4].mxu0 %v1703_v37 }
  0x9c   :  { %1358 = vmatpush3.bf16.msra.mxu1 %v1983_v29 }
  0x9d   :  { %1360 = vmatprep.subr.bf16.mxu1 %v1984_v59 }
  0xa0   :  { %1362 = vmatpush3.bf16.msra.mxu1 %v1985_v35 }
  0xa3   :  { %935 = vmatmul.mubr.f32.vlgmr.msra.gmra.mrb[4].mxu1 %v1703_v37 }
 0x12d   :  { %v993_v44 = vpop.f32.mrb[0].mxu0 }
 0x12e   :  { %v994_v53 = vpop.f32.mrb[1].mxu0 }
 0x12f   :  { %v995_v16 = vadd.f32 %v994_v53, %v993_v44 }
 0x131   :  { %v187_v4 = vadd.f32 %v995_v16, %v77_v49 }
 0x136   :  { %v1028_v48 = vpop.f32.mrb[0].mxu1 }
 0x137   :  { %v1029_v8 = vpop.f32.mrb[1].mxu1 }
 0x138   :  { %v1030_v19 = vadd.f32 %v1029_v8, %v1028_v48 }
 0x13a   :  { %v419_v11 = vadd.f32 %v1030_v19, %v187_v4 }
 0x14d   :  { %v1063_v54 = vpop.f32.mrb[2].mxu0 }
 0x14e   :  { %v1064_v18 = vpop.f32.mrb[3].mxu0 }
 0x14f   :  { %v1065_v31 = vadd.f32 %v1064_v18, %v1063_v54 }
 0x151   :  { %v557_v32 = vadd.f32 %v1065_v31, %v419_v11 }
 0x156   :  { %v1098_v36 = vpop.f32.mrb[2].mxu1 }
 0x157   :  { %v1099_v15 = vpop.f32.mrb[3].mxu1 }
 0x158   :  { %v1100_v21 = vadd.f32 %v1099_v15, %v1098_v36 }
 0x15a   :  { %v665_v37 = vadd.f32 %v1100_v21, %v557_v32 }
 0x16d   :  { %v1133_v34 = vpop.f32.mrb[4].mxu0 }
 0x16e   :  { %v1134_v25 = vpop.f32.mrb[5].mxu0 }
 0x16f   :  { %v1135_v26 = vadd.f32 %v1134_v25, %v1133_v34 }
 0x171   :  { %v833_v52 = vadd.f32 %v1135_v26, %v665_v37 }
 0x176   :  { %v1168_v28 = vpop.f32.mrb[4].mxu1 }
 0x177   :  { %v1169_v38 = vpop.f32.mrb[5].mxu1 }
 0x178   :  { %v1170_v40 = vadd.f32 %v1169_v38, %v1168_v28 }
 0x17a   :  { %v937_v43 = vadd.f32 %v1170_v40, %v833_v52 }
 0x17c   :  { %v940_v24 = vmul.f32 0.5, %v937_v43 }
 0x17e   :  { %1368 = vtanh.f32 %v940_v24 }
 0x188   :  { %v1369_v46 = vpop.eup %1368 }
 0x189   :  { %v942_v58 = vmul.f32 0.5, %v1369_v46 }
 0x18b   :  { %v943_v33 = vadd.f32 0.5, %v942_v58 }
 0x18d   :  { %944 = vst [vmem:[#allocation8] sm:$0xff] %v943_v33 }
 0x18e   :  { %1425 = shalt.err (!%p1422_p6)
}
 0x18f   :  { %s1426_s15 = scalar_lea.hbm %s1907_s3, 128 }
 0x190   :  { %p1427_p7 = scmp.ne.s32.totalorder %s1907_s3, %s1426_s15  ;;  %p1430_p8 = scmp.lt.u32.totalorder %s1426_s15, %s1907_s3 }
 0x192   :  { %p1432_p9 = pnand %p1430_p8, %p1427_p7 }
 0x194   :  { %1435 = shalt.err (!%p1432_p9)
}
 0x195   :  { %954 = dma.vmem_to_hbm [thread:$0]  %s952_s11, 128, %s1907_s3, [#allocation5]  }
 0x196   :  { %1440 = dma.done.wait [#allocation5], 128  }
 0x197   :  { %1441 = vsyncadd [#allocation5], 4294967168 }
 0x198   :  { %958 = vsyncpa [#allocation4], 1 }
 0x199   :  { %959 = vsyncpa [#allocation7], 1 }
 0x19a   :  { %960 = vsyncpa [#allocation5], 1 }

</bundles_post_ra>
